<compile_context>
chip_gen: v7x
topology: tpu7x:2x2x1
jax: 0.10.0
libtpu: 0.0.40
codegen_flags: <defaults>
</compile_context>

<pallas_src>
import math
from functools import partial

import jax
import jax.numpy as jnp
from jax import lax
from jax.experimental import pallas as pl
from jax.experimental.pallas import tpu as pltpu


def _round_up(x, m):
    return ((x + m - 1) // m) * m


def _tpu_defaults():
    """Per-generation scoped-VMEM budget + tile sizes.

    v5e/v6e have 128 MiB VMEM per TensorCore -> larger tiles amortize the
    ~0.35us/grid-step overhead; v7x has 64 MiB -> conservative budget.  Falls
    back to the conservative (v7x-safe) setting if the query is unavailable
    (e.g. interpret mode on CPU).
    """
    try:
        vmem = getattr(pltpu.get_tpu_info(), "vmem_capacity_bytes", None)
    except Exception:
        vmem = None
    if vmem is not None and vmem >= 96 * 1024 * 1024:   # v5e / v6e
        return 100 * 1024 * 1024, 512, 512
    return 48 * 1024 * 1024, 256, 256                   # v7x / unknown


_VMEM_LIMIT, _TM, _TQ = _tpu_defaults()
_W_BYTES_CAP = 16 * 1024 * 1024   # max VMEM-resident weight block in _linear
_NEG_INF = -1000000000.0          # Python literal (NOT a jnp scalar) -> no
                                  # "kernel captures constants" trace error


# ----------------------------------------------------------------------------
# Linear (projection) kernel: o = x @ w + b, row-tiled and pipelined.
# ----------------------------------------------------------------------------
def _linear_kernel(x_ref, w_ref, b_ref, o_ref):
    acc = jnp.dot(x_ref[...], w_ref[...], preferred_element_type=jnp.float32)
    o_ref[...] = (acc + b_ref[...].astype(jnp.float32)).astype(o_ref.dtype)


def _linear(x, w, b, *, tm=_TM):
    """x: [N, Cin] @ w: [Cin, Cout] + b: [1, Cout] -> [N, Cout]."""
    N, Cin = x.shape
    Cout = w.shape[1]

    # Row tile: never collapse to a single grid step for small N so the
    # "parallel" axis can still be split across both TensorCores on v7x.
    tm = min(tm, N)
    if tm == N and N >= 16:
        tm = _round_up(pl.cdiv(N, 2), 8)
    grid_m = pl.cdiv(N, tm)

    # Cout tile: keep the resident weight block under the VMEM budget.
    # TODO(synk): also tile Cin (f32 accumulator + "arbitrary" grid axis) for
    # very large Cin on v7x's 64 MiB VMEM.
    tn = Cout
    while tn > 256 and tn % 256 == 0 and Cin * tn * w.dtype.itemsize > _W_BYTES_CAP:
        tn //= 2
    grid_n = pl.cdiv(Cout, tn)

    itemsize = x.dtype.itemsize
    cost = pl.CostEstimate(
        flops=int(2 * N * Cin * Cout),
        transcendentals=0,
        bytes_accessed=int((N * Cin + Cin * Cout + Cout + N * Cout) * itemsize),
    )
    return pl.pallas_call(
        _linear_kernel,
        out_shape=jax.ShapeDtypeStruct((N, Cout), x.dtype),
        grid=(grid_m, grid_n),
        in_specs=[
            pl.BlockSpec((tm, Cin), lambda i, j: (i, 0)),   # pipelined row tiles
            pl.BlockSpec((Cin, tn), lambda i, j: (0, j)),   # weight (Cout-tiled) resident
            pl.BlockSpec((1, tn), lambda i, j: (0, j)),
        ],
        out_specs=pl.BlockSpec((tm, tn), lambda i, j: (i, j)),
        compiler_params=pltpu.CompilerParams(
            dimension_semantics=("parallel", "parallel"),
            vmem_limit_bytes=_VMEM_LIMIT,
        ),
        cost_estimate=cost,
    )(x, w, b)


# ----------------------------------------------------------------------------
# Attention + fused output projection: all heads of one (batch, q-tile) block.
#   q_ref:  [tq, C]       (C = H * d_k, natural [B,T,C] layout, no transposes)
#   kv_ref: [T_k, 2C]     (fused K|V projection output)
#   mask_ref (optional):  [tq, T_k] int8, shared across heads (nonzero = keep)
#   wo_ref: [C, C], bo_ref: [1, C]   (output projection, VMEM-resident)
#   o_ref:  [tq, C]       single lane-dense full-width store
# ----------------------------------------------------------------------------
def _mha_out_kernel(*refs, num_heads, d_k, scale, has_mask):
    if has_mask:
        q_ref, kv_ref, mask_ref, wo_ref, bo_ref, o_ref = refs
        keep = mask_ref[...] != 0             # loaded once, reused by every head
    else:
        q_ref, kv_ref, wo_ref, bo_ref, o_ref = refs
        keep = None

    C = num_heads * d_k
    # Fold 1/sqrt(d_k) into q once: one [tq, C] multiply instead of scaling
    # every [tq, T_k] score matrix (saves H*tq*T_k VPU multiplies per step).
    q_all = q_ref[...] * scale

    head_outs = []
    for h in range(num_heads):                # static unroll over heads
        qh = q_all[:, h * d_k:(h + 1) * d_k]                 # [tq, d_k]
        kh = kv_ref[:, h * d_k:(h + 1) * d_k]                # [T_k, d_k]
        vh = kv_ref[:, C + h * d_k:C + (h + 1) * d_k]        # [T_k, d_k]

        # scores = (q*scale) @ k^T, f32 accumulation on the MXU (no transpose copy)
        s = lax.dot_general(
            qh, kh, (((1,), (1,)), ((), ())),
            preferred_element_type=jnp.float32,
        )
        if keep is not None:
            s = jnp.where(keep, s, _NEG_INF)  # matches PyTorch masked_fill value

        # numerically stable softmax; normalization deferred past the PV matmul
        m = jnp.max(s, axis=-1, keepdims=True)
        p = jnp.exp(s - m)
        denom = jnp.sum(p, axis=-1, keepdims=True)           # [tq, 1]
        pv = jnp.dot(p.astype(vh.dtype), vh,
                     preferred_element_type=jnp.float32)     # [tq, d_k]
        # EUP-seeded reciprocal + one Newton step on the tiny [tq,1] tensor:
        # essentially free, keeps f32 (1e-4) parity with the reference.
        inv = pl.reciprocal(denom, approx=True)
        inv = inv * (2.0 - denom * inv)
        head_outs.append(pv * inv)            # tq*d_k multiplies, not tq*T_k

    # TODO(synk): for d_k=64 the head slices sit at 64-lane offsets (XLU rotates);
    # process head pairs on 128-aligned 2*d_k slices if bundles show XLU pressure.
    pre = jnp.concatenate(head_outs, axis=-1)                 # [tq, C] f32
    # fused output projection -> one lane-dense [tq, C] store, no HBM round trip
    out = jnp.dot(pre.astype(wo_ref.dtype), wo_ref[...],
                  preferred_element_type=jnp.float32)
    o_ref[...] = (out + bo_ref[...].astype(jnp.float32)).astype(o_ref.dtype)


def _attention_output(q, kv, mask_i8, wo, bo, num_heads, d_k, scale, *, tq=_TQ):
    """q: [B,T_q,C], kv: [B,T_k,2C], wo: [C,C], bo: [1,C] -> [B,T_q,C]."""
    B, T_q, C = q.shape
    T_k = kv.shape[1]
    tq = min(tq, T_q)
    grid = (B, pl.cdiv(T_q, tq))
    itemsize = q.dtype.itemsize

    has_mask = mask_i8 is not None
    kernel = partial(_mha_out_kernel, num_heads=num_heads, d_k=d_k, scale=scale,
                     has_mask=has_mask)

    in_specs = [
        pl.BlockSpec((None, tq, C), lambda b, i: (b, i, 0)),        # q tile
        # TODO(synk): pipeline_mode=pl.Buffered(1) here (index_map ignores the
        # q-tile axis so double-buffering buys nothing) and a KV-tile grid axis
        # with flash-style online softmax for long T_k on v7x's 64 MiB VMEM.
        pl.BlockSpec((None, T_k, 2 * C), lambda b, i: (b, 0, 0)),   # full KV of batch b
    ]
    args = [q, kv]
    bytes_accessed = (2 * B * T_q * C + 2 * B * T_k * C + C * C + C) * itemsize
    if has_mask:
        in_specs.append(pl.BlockSpec((None, tq, T_k), lambda b, i: (b, i, 0)))
        args.append(mask_i8)
        bytes_accessed += B * T_q * T_k       # int8 mask, no head broadcast
    in_specs += [
        pl.BlockSpec((C, C), lambda b, i: (0, 0)),    # W_out stays VMEM-resident
        pl.BlockSpec((1, C), lambda b, i: (0, 0)),    # b_out
    ]
    args += [wo, bo]

    cost = pl.CostEstimate(
        flops=int(4 * B * T_q * T_k * C + 2 * B * T_q * C * C),
        transcendentals=int(B * num_heads * T_q * T_k),
        bytes_accessed=int(bytes_accessed),
    )
    return pl.pallas_call(
        kernel,
        out_shape=jax.ShapeDtypeStruct((B, T_q, C), q.dtype),
        grid=grid,
        in_specs=in_specs,
        out_specs=pl.BlockSpec((None, tq, C), lambda b, i: (b, i, 0)),
        compiler_params=pltpu.CompilerParams(
            dimension_semantics=("parallel", "parallel"),
            vmem_limit_bytes=_VMEM_LIMIT,
        ),
        cost_estimate=cost,
    )(*args)


# ----------------------------------------------------------------------------
# Module wrapper
# ----------------------------------------------------------------------------
def init_params(key, hidden_size):
    """Deterministic nn.Linear-style uniform init for q/k/v/output projections."""
    bound = 1.0 / math.sqrt(hidden_size)
    params = {}
    for name in ("query", "key", "value", "output"):
        key, kw, kb = jax.random.split(key, 3)
        params[name] = {
            "w": jax.random.uniform(
                kw, (hidden_size, hidden_size), jnp.float32, -bound, bound
            ),
            "b": jax.random.uniform(kb, (1, hidden_size), jnp.float32, -bound, bound),
        }
    return params


def prepare_params(params):
    """Pre-materialize the fused K|V projection weights once (outside the jitted
    forward) instead of concatenating 2*C*C bytes in HBM on every call."""
    return {
        "wq": params["query"]["w"], "bq": params["query"]["b"],
        "w_kv": jnp.concatenate([params["key"]["w"], params["value"]["w"]], axis=1),
        "b_kv": jnp.concatenate([params["key"]["b"], params["value"]["b"]], axis=1),
        "wo": params["output"]["w"], "bo": params["output"]["b"],
    }


def _prep_mask(mask, B, T_q, T_k):
    """Normalize a user mask to a head-shared [B, T_q, T_k] int8 keep-mask."""
    if mask is None:
        return None
    m = jnp.asarray(mask)
    if m.ndim == 4:
        if m.shape[1] != 1:
            # TODO(synk): true per-head [B,H,T_q,T_k] masks need a per-head mask
            # block in the kernel; reject rather than silently using head 0.
            raise NotImplementedError(
                "per-head attention masks are not supported by this kernel")
        m = m[:, 0]
    m = jnp.broadcast_to(m, (B, T_q, T_k))
    return (m != 0).astype(jnp.int8)


def mha_enc_dec_attention(prepared, src, dst, num_heads, mask=None):
    """Pallas implementation of MultiHeadedEncoderDecoderAttention.forward.

    src: [B, T_k, C], dst: [B, T_q, C]  ->  [B, T_q, C]
    mask (optional): broadcastable over heads to [B, T_q, T_k]; nonzero = keep.
    """
    B, T_k, C = src.shape
    T_q = dst.shape[1]
    if C % num_heads != 0:
        raise ValueError(
            f"hidden_size={C} must be a multiple of num_heads={num_heads}")
    d_k = C // num_heads
    scale = 1.0 / math.sqrt(d_k)

    # Cast params to the activation dtype so bf16 activations take the bf16 MXU
    # fast path (accumulation stays f32 via preferred_element_type). No-op for f32.
    dt = dst.dtype
    wq, bq = prepared["wq"].astype(dt), prepared["bq"].astype(dt)
    w_kv, b_kv = prepared["w_kv"].astype(dt), prepared["b_kv"].astype(dt)
    wo, bo = prepared["wo"].astype(dt), prepared["bo"].astype(dt)

    # Q projection and fused K|V projection (src read once, 2C-wide MXU N dim).
    q = _linear(dst.reshape(B * T_q, C), wq, bq).reshape(B, T_q, C)
    kv = _linear(src.reshape(B * T_k, C), w_kv, b_kv).reshape(B, T_k, 2 * C)

    mask_i8 = _prep_mask(mask, B, T_q, T_k)

    # Attention in the natural [B, T, H*d_k] layout (head split/merge via static
    # slices inside the kernel) with the output projection fused in the epilogue.
    return _attention_output(q, kv, mask_i8, wo, bo, num_heads, d_k, scale)


# ----------------------------------------------------------------------------
# Pure-JAX reference (for correctness check)
# ----------------------------------------------------------------------------
def reference(params, src, dst, num_heads, mask=None):
    B, T_k, C = src.shape
    T_q = dst.shape[1]
    d_k = C // num_heads
    scale = 1.0 / math.sqrt(d_k)

    def lin(x, p):
        return x @ p["w"] + p["b"]

    q = lin(dst, params["query"]).reshape(B, T_q, num_heads, d_k).transpose(0, 2, 1, 3)
    k = lin(src, params["key"]).reshape(B, T_k, num_heads, d_k).transpose(0, 2, 1, 3)
    v = lin(src, params["value"]).reshape(B, T_k, num_heads, d_k).transpose(0, 2, 1, 3)

    s = jnp.einsum("bhqd,bhkd->bhqk", q, k) * scale
    if mask is not None:
        s = jnp.where(
            jnp.broadcast_to(mask, s.shape) != 0, s, jnp.float32(-1000000000.0)
        )
    attn = jax.nn.softmax(s, axis=-1)
    pre = jnp.einsum("bhqk,bhkd->bhqd", attn, v)
    pre = pre.transpose(0, 2, 1, 3).reshape(B, T_q, C)
    return lin(pre, params["output"])


# ----------------------------------------------------------------------------
if __name__ == "__main__":
    B, T_k, T_q = 2, 16, 8
    hidden_size, num_heads = 32, 4

    key = jax.random.PRNGKey(0)
    k_params, k_src, k_dst = jax.random.split(key, 3)

    params = init_params(k_params, hidden_size)
    prepared = prepare_params(params)       # fused K|V weights, outside jit
    src = jax.random.normal(k_src, (B, T_k, hidden_size), jnp.float32)
    dst = jax.random.normal(k_dst, (B, T_q, hidden_size), jnp.float32)

    fwd = jax.jit(mha_enc_dec_attention, static_argnames=("num_heads",))

    # --- no-mask path (dedicated kernel variant, no mask DMA at all) ---
    out = jax.block_until_ready(fwd(prepared, src, dst, num_heads=num_heads))
    ref = reference(params, src, dst, num_heads, mask=None)
    assert out.shape == (B, T_q, hidden_size)
    assert jnp.allclose(out, ref, atol=1e-4, rtol=1e-4), "mismatch (no mask)"

    # --- masked path (key-padding mask, broadcast over heads, int8 in-kernel) ---
    keep = jnp.ones((B, 1, 1, T_k), jnp.bool_)
    keep = keep.at[1, :, :, T_k - 5:].set(False)
    out_m = jax.block_until_ready(
        fwd(prepared, src, dst, num_heads=num_heads, mask=keep))
    ref_m = reference(params, src, dst, num_heads, mask=keep)
    assert jnp.allclose(out_m, ref_m, atol=1e-4, rtol=1e-4), "mismatch (masked)"

    print("KERNEL_OK")
</pallas_src>

<mosaic_0001>
module attributes {stable_mosaic.version = 11 : i64} {
  func.func @_linear_kernel(%arg0: i32, %arg1: i32, %arg2: memref<8x32xf32, #tpu.memory_space<vmem>>, %arg3: memref<32x32xf32, #tpu.memory_space<vmem>>, %arg4: memref<1x32xf32, #tpu.memory_space<vmem>>, %arg5: memref<8x32xf32, #tpu.memory_space<vmem>>) attributes {dimension_semantics = [#tpu.dimension_semantics<parallel>, #tpu.dimension_semantics<parallel>], iteration_bounds = array<i64: 2, 1>, scalar_prefetch = 0 : i64, scratch_operands = 0 : i64, tpu.core_type = #tpu.core_type<tc>, window_params = [{transform_indices = @transform_0, window_bounds = array<i64: 8, 32>}, {transform_indices = @transform_1, window_bounds = array<i64: 32, 32>}, {transform_indices = @transform_2, window_bounds = array<i64: 1, 32>}, {transform_indices = @transform_3, window_bounds = array<i64: 8, 32>}]} {
    %c0 = arith.constant 0 : index
    %c0_0 = arith.constant 0 : index
    %0 = vector.load %arg2[%c0, %c0_0] : memref<8x32xf32, #tpu.memory_space<vmem>>, vector<8x32xf32>
    %c0_1 = arith.constant 0 : index
    %c0_2 = arith.constant 0 : index
    %1 = vector.load %arg3[%c0_1, %c0_2] : memref<32x32xf32, #tpu.memory_space<vmem>>, vector<32x32xf32>
    %cst = arith.constant dense<0.000000e+00> : vector<8x32xf32>
    %2 = tpu.matmul %0, %1, %cst {dimension_numbers = #tpu.dot_dimension_numbers<[1], [0], [0], [1], [0, 0, 1, 1], [], []>} : vector<8x32xf32>, vector<32x32xf32>, vector<8x32xf32> -> vector<8x32xf32>
    %c0_3 = arith.constant 0 : index
    %c0_4 = arith.constant 0 : index
    %3 = vector.load %arg4[%c0_3, %c0_4] : memref<1x32xf32, #tpu.memory_space<vmem>>, vector<1x32xf32>
    %4 = vector.broadcast %3 : vector<1x32xf32> to vector<8x32xf32>
    %5 = arith.addf %2, %4 : vector<8x32xf32>
    %c0_5 = arith.constant 0 : index
    %c0_6 = arith.constant 0 : index
    %6 = vector.load %arg5[%c0_5, %c0_6] : memref<8x32xf32, #tpu.memory_space<vmem>>, vector<8x32xf32>
    tpu.vector_store %arg5[%c0_5, %c0_6], %5 {strides = array<i32>} : memref<8x32xf32, #tpu.memory_space<vmem>>, vector<8x32xf32>,
    return
  }
  func.func @transform_0(%arg0: i32, %arg1: i32) -> (i32, i32) {
    %c0_i32 = arith.constant 0 : i32
    %c0_i32_0 = arith.constant 0 : i32
    return %arg0, %c0_i32 : i32, i32
  }
  func.func @transform_1(%arg0: i32, %arg1: i32) -> (i32, i32) {
    %c0_i32 = arith.constant 0 : i32
    %c0_i32_0 = arith.constant 0 : i32
    return %c0_i32, %arg1 : i32, i32
  }
  func.func @transform_2(%arg0: i32, %arg1: i32) -> (i32, i32) {
    %c0_i32 = arith.constant 0 : i32
    %c0_i32_0 = arith.constant 0 : i32
    return %c0_i32, %arg1 : i32, i32
  }
  func.func @transform_3(%arg0: i32, %arg1: i32) -> (i32, i32) {
    %c0_i32 = arith.constant 0 : i32
    return %arg0, %arg1 : i32, i32
  }
}

module attributes {stable_mosaic.version = 11 : i64} {
  func.func @_linear_kernel(%arg0: i32, %arg1: i32, %arg2: memref<16x32xf32, #tpu.memory_space<vmem>>, %arg3: memref<32x64xf32, #tpu.memory_space<vmem>>, %arg4: memref<1x64xf32, #tpu.memory_space<vmem>>, %arg5: memref<16x64xf32, #tpu.memory_space<vmem>>) attributes {dimension_semantics = [#tpu.dimension_semantics<parallel>, #tpu.dimension_semantics<parallel>], iteration_bounds = array<i64: 2, 1>, scalar_prefetch = 0 : i64, scratch_operands = 0 : i64, tpu.core_type = #tpu.core_type<tc>, window_params = [{transform_indices = @transform_0, window_bounds = array<i64: 16, 32>}, {transform_indices = @transform_1, window_bounds = array<i64: 32, 64>}, {transform_indices = @transform_2, window_bounds = array<i64: 1, 64>}, {transform_indices = @transform_3, window_bounds = array<i64: 16, 64>}]} {
    %c0 = arith.constant 0 : index
    %c0_0 = arith.constant 0 : index
    %0 = vector.load %arg2[%c0, %c0_0] : memref<16x32xf32, #tpu.memory_space<vmem>>, vector<16x32xf32>
    %c0_1 = arith.constant 0 : index
    %c0_2 = arith.constant 0 : index
    %1 = vector.load %arg3[%c0_1, %c0_2] : memref<32x64xf32, #tpu.memory_space<vmem>>, vector<32x64xf32>
    %cst = arith.constant dense<0.000000e+00> : vector<16x64xf32>
    %2 = tpu.matmul %0, %1, %cst {dimension_numbers = #tpu.dot_dimension_numbers<[1], [0], [0], [1], [0, 0, 1, 1], [], []>} : vector<16x32xf32>, vector<32x64xf32>, vector<16x64xf32> -> vector<16x64xf32>
    %c0_3 = arith.constant 0 : index
    %c0_4 = arith.constant 0 : index
    %3 = vector.load %arg4[%c0_3, %c0_4] : memref<1x64xf32, #tpu.memory_space<vmem>>, vector<1x64xf32>
    %4 = vector.broadcast %3 : vector<1x64xf32> to vector<16x64xf32>
    %5 = arith.addf %2, %4 : vector<16x64xf32>
    %c0_5 = arith.constant 0 : index
    %c0_6 = arith.constant 0 : index
    %6 = vector.load %arg5[%c0_5, %c0_6] : memref<16x64xf32, #tpu.memory_space<vmem>>, vector<16x64xf32>
    tpu.vector_store %arg5[%c0_5, %c0_6], %5 {strides = array<i32>} : memref<16x64xf32, #tpu.memory_space<vmem>>, vector<16x64xf32>,
    return
  }
  func.func @transform_0(%arg0: i32, %arg1: i32) -> (i32, i32) {
    %c0_i32 = arith.constant 0 : i32
    %c0_i32_0 = arith.constant 0 : i32
    return %arg0, %c0_i32 : i32, i32
  }
  func.func @transform_1(%arg0: i32, %arg1: i32) -> (i32, i32) {
    %c0_i32 = arith.constant 0 : i32
    %c0_i32_0 = arith.constant 0 : i32
    return %c0_i32, %arg1 : i32, i32
  }
  func.func @transform_2(%arg0: i32, %arg1: i32) -> (i32, i32) {
    %c0_i32 = arith.constant 0 : i32
    %c0_i32_0 = arith.constant 0 : i32
    return %c0_i32, %arg1 : i32, i32
  }
  func.func @transform_3(%arg0: i32, %arg1: i32) -> (i32, i32) {
    %c0_i32 = arith.constant 0 : i32
    return %arg0, %arg1 : i32, i32
  }
}

module attributes {stable_mosaic.version = 11 : i64} {
  func.func @_mha_out_kernel(%arg0: i32, %arg1: i32, %arg2: memref<1x8x32xf32, #tpu.memory_space<vmem>>, %arg3: memref<1x16x64xf32, #tpu.memory_space<vmem>>, %arg4: memref<32x32xf32, #tpu.memory_space<vmem>>, %arg5: memref<1x32xf32, #tpu.memory_space<vmem>>, %arg6: memref<1x8x32xf32, #tpu.memory_space<vmem>>) attributes {dimension_semantics = [#tpu.dimension_semantics<parallel>, #tpu.dimension_semantics<parallel>], iteration_bounds = array<i64: 2, 1>, scalar_prefetch = 0 : i64, scratch_operands = 0 : i64, tpu.core_type = #tpu.core_type<tc>, window_params = [{transform_indices = @transform_0, window_bounds = array<i64: 1, 8, 32>}, {transform_indices = @transform_1, window_bounds = array<i64: 1, 16, 64>}, {pipeline_mode = #tpu.pipeline_mode<synchronous>, transform_indices = @transform_2, window_bounds = array<i64: 32, 32>}, {pipeline_mode = #tpu.pipeline_mode<synchronous>, transform_indices = @transform_3, window_bounds = array<i64: 1, 32>}, {transform_indices = @transform_4, window_bounds = array<i64: 1, 8, 32>}]} {
    %c0 = arith.constant 0 : index
    %c0_0 = arith.constant 0 : index
    %c0_1 = arith.constant 0 : index
    %0 = vector.load %arg2[%c0, %c0_0, %c0_1] : memref<1x8x32xf32, #tpu.memory_space<vmem>>, vector<1x8x32xf32>
    %1 = vector.shape_cast %0 : vector<1x8x32xf32> to vector<8x32xf32>
    %cst = arith.constant 0.353553385 : f32
    %2 = vector.broadcast %cst : f32 to vector<8x32xf32>
    %3 = arith.mulf %1, %2 : vector<8x32xf32>
    %4 = vector.extract_strided_slice %3 {offsets = [0, 0], sizes = [8, 8], strides = [1, 1]} : vector<8x32xf32> to vector<8x8xf32>
    %c0_2 = arith.constant 0 : index
    %c0_3 = arith.constant 0 : index
    %c0_4 = arith.constant 0 : index
    %5 = vector.load %arg3[%c0_2, %c0_3, %c0_4] : memref<1x16x64xf32, #tpu.memory_space<vmem>>, vector<1x16x8xf32>
    %6 = vector.shape_cast %5 : vector<1x16x8xf32> to vector<16x8xf32>
    %c0_5 = arith.constant 0 : index
    %c0_6 = arith.constant 0 : index
    %c32 = arith.constant 32 : index
    %7 = vector.load %arg3[%c0_5, %c0_6, %c32] : memref<1x16x64xf32, #tpu.memory_space<vmem>>, vector<1x16x8xf32>
    %8 = vector.shape_cast %7 : vector<1x16x8xf32> to vector<16x8xf32>
    %cst_7 = arith.constant dense<0.000000e+00> : vector<8x16xf32>
    %9 = tpu.matmul %4, %6, %cst_7 {dimension_numbers = #tpu.dot_dimension_numbers<[1], [1], [0], [0], [0, 0, 1, 0], [], []>} : vector<8x8xf32>, vector<16x8xf32>, vector<8x16xf32> -> vector<8x16xf32>
    %cst_8 = arith.constant dense<0xFF800000> : vector<8xf32>
    %10 = vector.multi_reduction <maximumf>, %9, %cst_8 [1] : vector<8x16xf32> to vector<8xf32>
    %11 = vector.shape_cast %10 : vector<8xf32> to vector<8x1xf32>
    %12 = vector.broadcast %11 : vector<8x1xf32> to vector<8x16xf32>
    %13 = arith.subf %9, %12 : vector<8x16xf32>
    %14 = math.exp %13 : vector<8x16xf32>
    %cst_9 = arith.constant dense<0.000000e+00> : vector<8xf32>
    %15 = vector.multi_reduction <add>, %14, %cst_9 [1] : vector<8x16xf32> to vector<8xf32>
    %16 = vector.shape_cast %15 : vector<8xf32> to vector<8x1xf32>
    %cst_10 = arith.constant dense<0.000000e+00> : vector<8x8xf32>
    %17 = tpu.matmul %14, %8, %cst_10 {dimension_numbers = #tpu.dot_dimension_numbers<[1], [0], [0], [1], [0, 0, 1, 1], [], []>} : vector<8x16xf32>, vector<16x8xf32>, vector<8x8xf32> -> vector<8x8xf32>
    %18 = tpu.reciprocal %16 {approx = true} : vector<8x1xf32> -> vector<8x1xf32>
    %19 = arith.mulf %16, %18 : vector<8x1xf32>
    %cst_11 = arith.constant 2.000000e+00 : f32
    %20 = vector.broadcast %cst_11 : f32 to vector<8x1xf32>
    %21 = arith.subf %20, %19 : vector<8x1xf32>
    %22 = arith.mulf %18, %21 : vector<8x1xf32>
    %23 = vector.broadcast %22 : vector<8x1xf32> to vector<8x8xf32>
    %24 = arith.mulf %17, %23 : vector<8x8xf32>
    %25 = vector.extract_strided_slice %3 {offsets = [0, 8], sizes = [8, 8], strides = [1, 1]} : vector<8x32xf32> to vector<8x8xf32>
    %c0_12 = arith.constant 0 : index
    %c0_13 = arith.constant 0 : index
    %c8 = arith.constant 8 : index
    %26 = vector.load %arg3[%c0_12, %c0_13, %c8] : memref<1x16x64xf32, #tpu.memory_space<vmem>>, vector<1x16x8xf32>
    %27 = vector.shape_cast %26 : vector<1x16x8xf32> to vector<16x8xf32>
    %c0_14 = arith.constant 0 : index
    %c0_15 = arith.constant 0 : index
    %c40 = arith.constant 40 : index
    %28 = vector.load %arg3[%c0_14, %c0_15, %c40] : memref<1x16x64xf32, #tpu.memory_space<vmem>>, vector<1x16x8xf32>
    %29 = vector.shape_cast %28 : vector<1x16x8xf32> to vector<16x8xf32>
    %cst_16 = arith.constant dense<0.000000e+00> : vector<8x16xf32>
    %30 = tpu.matmul %25, %27, %cst_16 {dimension_numbers = #tpu.dot_dimension_numbers<[1], [1], [0], [0], [0, 0, 1, 0], [], []>} : vector<8x8xf32>, vector<16x8xf32>, vector<8x16xf32> -> vector<8x16xf32>
    %cst_17 = arith.constant dense<0xFF800000> : vector<8xf32>
    %31 = vector.multi_reduction <maximumf>, %30, %cst_17 [1] : vector<8x16xf32> to vector<8xf32>
    %32 = vector.shape_cast %31 : vector<8xf32> to vector<8x1xf32>
    %33 = vector.broadcast %32 : vector<8x1xf32> to vector<8x16xf32>
    %34 = arith.subf %30, %33 : vector<8x16xf32>
    %35 = math.exp %34 : vector<8x16xf32>
    %cst_18 = arith.constant dense<0.000000e+00> : vector<8xf32>
    %36 = vector.multi_reduction <add>, %35, %cst_18 [1] : vector<8x16xf32> to vector<8xf32>
    %37 = vector.shape_cast %36 : vector<8xf32> to vector<8x1xf32>
    %cst_19 = arith.constant dense<0.000000e+00> : vector<8x8xf32>
    %38 = tpu.matmul %35, %29, %cst_19 {dimension_numbers = #tpu.dot_dimension_numbers<[1], [0], [0], [1], [0, 0, 1, 1], [], []>} : vector<8x16xf32>, vector<16x8xf32>, vector<8x8xf32> -> vector<8x8xf32>
    %39 = tpu.reciprocal %37 {approx = true} : vector<8x1xf32> -> vector<8x1xf32>
    %40 = arith.mulf %37, %39 : vector<8x1xf32>
    %cst_20 = arith.constant 2.000000e+00 : f32
    %41 = vector.broadcast %cst_20 : f32 to vector<8x1xf32>
    %42 = arith.subf %41, %40 : vector<8x1xf32>
    %43 = arith.mulf %39, %42 : vector<8x1xf32>
    %44 = vector.broadcast %43 : vector<8x1xf32> to vector<8x8xf32>
    %45 = arith.mulf %38, %44 : vector<8x8xf32>
    %46 = vector.extract_strided_slice %3 {offsets = [0, 16], sizes = [8, 8], strides = [1, 1]} : vector<8x32xf32> to vector<8x8xf32>
    %c0_21 = arith.constant 0 : index
    %c0_22 = arith.constant 0 : index
    %c16 = arith.constant 16 : index
    %47 = vector.load %arg3[%c0_21, %c0_22, %c16] : memref<1x16x64xf32, #tpu.memory_space<vmem>>, vector<1x16x8xf32>
    %48 = vector.shape_cast %47 : vector<1x16x8xf32> to vector<16x8xf32>
    %c0_23 = arith.constant 0 : index
    %c0_24 = arith.constant 0 : index
    %c48 = arith.constant 48 : index
    %49 = vector.load %arg3[%c0_23, %c0_24, %c48] : memref<1x16x64xf32, #tpu.memory_space<vmem>>, vector<1x16x8xf32>
    %50 = vector.shape_cast %49 : vector<1x16x8xf32> to vector<16x8xf32>
    %cst_25 = arith.constant dense<0.000000e+00> : vector<8x16xf32>
    %51 = tpu.matmul %46, %48, %cst_25 {dimension_numbers = #tpu.dot_dimension_numbers<[1], [1], [0], [0], [0, 0, 1, 0], [], []>} : vector<8x8xf32>, vector<16x8xf32>, vector<8x16xf32> -> vector<8x16xf32>
    %cst_26 = arith.constant dense<0xFF800000> : vector<8xf32>
    %52 = vector.multi_reduction <maximumf>, %51, %cst_26 [1] : vector<8x16xf32> to vector<8xf32>
    %53 = vector.shape_cast %52 : vector<8xf32> to vector<8x1xf32>
    %54 = vector.broadcast %53 : vector<8x1xf32> to vector<8x16xf32>
    %55 = arith.subf %51, %54 : vector<8x16xf32>
    %56 = math.exp %55 : vector<8x16xf32>
    %cst_27 = arith.constant dense<0.000000e+00> : vector<8xf32>
    %57 = vector.multi_reduction <add>, %56, %cst_27 [1] : vector<8x16xf32> to vector<8xf32>
    %58 = vector.shape_cast %57 : vector<8xf32> to vector<8x1xf32>
    %cst_28 = arith.constant dense<0.000000e+00> : vector<8x8xf32>
    %59 = tpu.matmul %56, %50, %cst_28 {dimension_numbers = #tpu.dot_dimension_numbers<[1], [0], [0], [1], [0, 0, 1, 1], [], []>} : vector<8x16xf32>, vector<16x8xf32>, vector<8x8xf32> -> vector<8x8xf32>
    %60 = tpu.reciprocal %58 {approx = true} : vector<8x1xf32> -> vector<8x1xf32>
    %61 = arith.mulf %58, %60 : vector<8x1xf32>
    %cst_29 = arith.constant 2.000000e+00 : f32
    %62 = vector.broadcast %cst_29 : f32 to vector<8x1xf32>
    %63 = arith.subf %62, %61 : vector<8x1xf32>
    %64 = arith.mulf %60, %63 : vector<8x1xf32>
    %65 = vector.broadcast %64 : vector<8x1xf32> to vector<8x8xf32>
    %66 = arith.mulf %59, %65 : vector<8x8xf32>
    %67 = vector.extract_strided_slice %3 {offsets = [0, 24], sizes = [8, 8], strides = [1, 1]} : vector<8x32xf32> to vector<8x8xf32>
    %c0_30 = arith.constant 0 : index
    %c0_31 = arith.constant 0 : index
    %c24 = arith.constant 24 : index
    %68 = vector.load %arg3[%c0_30, %c0_31, %c24] : memref<1x16x64xf32, #tpu.memory_space<vmem>>, vector<1x16x8xf32>
    %69 = vector.shape_cast %68 : vector<1x16x8xf32> to vector<16x8xf32>
    %c0_32 = arith.constant 0 : index
    %c0_33 = arith.constant 0 : index
    %c56 = arith.constant 56 : index
    %70 = vector.load %arg3[%c0_32, %c0_33, %c56] : memref<1x16x64xf32, #tpu.memory_space<vmem>>, vector<1x16x8xf32>
    %71 = vector.shape_cast %70 : vector<1x16x8xf32> to vector<16x8xf32>
    %cst_34 = arith.constant dense<0.000000e+00> : vector<8x16xf32>
    %72 = tpu.matmul %67, %69, %cst_34 {dimension_numbers = #tpu.dot_dimension_numbers<[1], [1], [0], [0], [0, 0, 1, 0], [], []>} : vector<8x8xf32>, vector<16x8xf32>, vector<8x16xf32> -> vector<8x16xf32>
    %cst_35 = arith.constant dense<0xFF800000> : vector<8xf32>
    %73 = vector.multi_reduction <maximumf>, %72, %cst_35 [1] : vector<8x16xf32> to vector<8xf32>
    %74 = vector.shape_cast %73 : vector<8xf32> to vector<8x1xf32>
    %75 = vector.broadcast %74 : vector<8x1xf32> to vector<8x16xf32>
    %76 = arith.subf %72, %75 : vector<8x16xf32>
    %77 = math.exp %76 : vector<8x16xf32>
    %cst_36 = arith.constant dense<0.000000e+00> : vector<8xf32>
    %78 = vector.multi_reduction <add>, %77, %cst_36 [1] : vector<8x16xf32> to vector<8xf32>
    %79 = vector.shape_cast %78 : vector<8xf32> to vector<8x1xf32>
    %cst_37 = arith.constant dense<0.000000e+00> : vector<8x8xf32>
    %80 = tpu.matmul %77, %71, %cst_37 {dimension_numbers = #tpu.dot_dimension_numbers<[1], [0], [0], [1], [0, 0, 1, 1], [], []>} : vector<8x16xf32>, vector<16x8xf32>, vector<8x8xf32> -> vector<8x8xf32>
    %81 = tpu.reciprocal %79 {approx = true} : vector<8x1xf32> -> vector<8x1xf32>
    %82 = arith.mulf %79, %81 : vector<8x1xf32>
    %cst_38 = arith.constant 2.000000e+00 : f32
    %83 = vector.broadcast %cst_38 : f32 to vector<8x1xf32>
    %84 = arith.subf %83, %82 : vector<8x1xf32>
    %85 = arith.mulf %81, %84 : vector<8x1xf32>
    %86 = vector.broadcast %85 : vector<8x1xf32> to vector<8x8xf32>
    %87 = arith.mulf %80, %86 : vector<8x8xf32>
    %88 = tpu.concatenate %24, %45, %66, %87 in 1 : vector<8x8xf32>, vector<8x8xf32>, vector<8x8xf32>, vector<8x8xf32> -> vector<8x32xf32>
    %c0_39 = arith.constant 0 : index
    %c0_40 = arith.constant 0 : index
    %89 = vector.load %arg4[%c0_39, %c0_40] : memref<32x32xf32, #tpu.memory_space<vmem>>, vector<32x32xf32>
    %cst_41 = arith.constant dense<0.000000e+00> : vector<8x32xf32>
    %90 = tpu.matmul %88, %89, %cst_41 {dimension_numbers = #tpu.dot_dimension_numbers<[1], [0], [0], [1], [0, 0, 1, 1], [], []>} : vector<8x32xf32>, vector<32x32xf32>, vector<8x32xf32> -> vector<8x32xf32>
    %c0_42 = arith.constant 0 : index
    %c0_43 = arith.constant 0 : index
    %91 = vector.load %arg5[%c0_42, %c0_43] : memref<1x32xf32, #tpu.memory_space<vmem>>, vector<1x32xf32>
    %92 = vector.broadcast %91 : vector<1x32xf32> to vector<8x32xf32>
    %93 = arith.addf %90, %92 : vector<8x32xf32>
    %c0_44 = arith.constant 0 : index
    %c0_45 = arith.constant 0 : index
    %c0_46 = arith.constant 0 : index
    %94 = vector.load %arg6[%c0_44, %c0_45, %c0_46] : memref<1x8x32xf32, #tpu.memory_space<vmem>>, vector<1x8x32xf32>
    %95 = vector.shape_cast %94 : vector<1x8x32xf32> to vector<8x32xf32>
    %96 = vector.shape_cast %93 : vector<8x32xf32> to vector<1x8x32xf32>
    tpu.vector_store %arg6[%c0_44, %c0_45, %c0_46], %96 {strides = array<i32>} : memref<1x8x32xf32, #tpu.memory_space<vmem>>, vector<1x8x32xf32>,
    return
  }
  func.func @transform_0(%arg0: i32, %arg1: i32) -> (i32, i32, i32) {
    %c0_i32 = arith.constant 0 : i32
    %c0_i32_0 = arith.constant 0 : i32
    return %arg0, %arg1, %c0_i32 : i32, i32, i32
  }
  func.func @transform_1(%arg0: i32, %arg1: i32) -> (i32, i32, i32) {
    %c0_i32 = arith.constant 0 : i32
    %c0_i32_0 = arith.constant 0 : i32
    %c0_i32_1 = arith.constant 0 : i32
    return %arg0, %c0_i32, %c0_i32_0 : i32, i32, i32
  }
  func.func @transform_2(%arg0: i32, %arg1: i32) -> (i32, i32) {
    %c0_i32 = arith.constant 0 : i32
    %c0_i32_0 = arith.constant 0 : i32
    %c0_i32_1 = arith.constant 0 : i32
    return %c0_i32, %c0_i32_0 : i32, i32
  }
  func.func @transform_3(%arg0: i32, %arg1: i32) -> (i32, i32) {
    %c0_i32 = arith.constant 0 : i32
    %c0_i32_0 = arith.constant 0 : i32
    %c0_i32_1 = arith.constant 0 : i32
    return %c0_i32, %c0_i32_0 : i32, i32
  }
  func.func @transform_4(%arg0: i32, %arg1: i32) -> (i32, i32, i32) {
    %c0_i32 = arith.constant 0 : i32
    %c0_i32_0 = arith.constant 0 : i32
    return %arg0, %arg1, %c0_i32 : i32, i32, i32
  }
}

</mosaic_0001>

<bundles_post_ra>
// kernel: mha_enc_dec_attention.3
= control target key start
LH: loop header
LB: loop body
LE: loop exit
PB: predicated region body
PF: predicated region fallthrough
CT: control target
= control target key end

     0   :  { %8 = vsyncpa [#allocation3], 0  ;;  %s565_s12 = smov 0   ;;  %s567_s13 = smov 0   ;;  %s644_s0 = inlined_call_operand.vmem [shape: f32[16,32], index: 0, kind: input, shape index: {}]   ;;  %s645_s1 = inlined_call_operand.hbm [shape: f32[32,32], index: 1, kind: input, shape index: {}]   ;;  %s646_s2 = inlined_call_operand.vmem [shape: f32[1,32], index: 2, kind: input, shape index: {}]   ;;  %s647_s3 = inlined_call_operand.vmem [shape: f32[16,32], index: 3, kind: output, shape index: {}]  }
   0x1   :  { %s569_s14 = smov 0  }
   0x2 LB: > { %s407_s15 = sadd.s32 4294967295, %s537_s14   ;;  %s26_s16 = sadd.s32 1, %s533_s13  ;;  %s537_s14 = sphi %s569_s14, %s14_s14   ;;  %s533_s13 = sphi %s567_s13, %s657_s13   ;;  %s529_s12 = sphi %s565_s12, %s656_s12  }
   0x3   : > { %p28_p0 = scmp.ge.s32.totalorder %s26_s16, 2  ;;  %p409_p1 = scmp.ge.s32.totalorder %s537_s14, 1 }
   0x4   : > { %p137_p2 = scmp.lt.s32.totalorder %s537_s14, 3  ;;  %p590_p4 = scmp.eq.s32.totalorder %s407_s15, 0 }
   0x5   : > { %s659_s16 = smov (%p28_p0, %s26_s16), 0  ;;  %s539_s19 = smov [#allocation2]  }
   0x6   : > { %p586_p3 = pnand %p409_p1, %p137_p2  ;;  %s151_s20 = sshll.u32 %s539_s19, 4  ;;  %s152_s20 = int_to_ptr.vmem [resolvable:$true] %s151_s20 }
   0x7   : > { %s652_s18 = scalar_select %p590_p4, 1, 0 }
   0x8   : > { %s651_s17 = scalar_select %p586_p3, 1, 0 }
   0x9   : > { %p447_p5 = pneg %p586_p3  ;;  %s483_s24 = scalar_lea.hbm %s645_s1, 512 }
   0xa   : > { %p484_p7 = scmp.ne.s32.totalorder %s645_s1, %s483_s24  ;;  %p490_p11 = scmp.lt.u32.totalorder %s483_s24, %s645_s1 }
   0xb   : > { %p598_p6 = pnand %p590_p4, %p447_p5 }
   0xd   : > { %p485_p8 = pneg %p598_p6 }
   0xf   : > { %p486_p9 = pnand %p485_p8, %p484_p7 }
  0x11   : > { %p487_p10 = pneg %p486_p9 }
  0x13   : > { %p492_p12 = pnand %p490_p11, %p487_p10 }
  0x15   : > { %495 = shalt.err (!%p492_p12)
}
  0x16   : > { %s496_s29 = scalar_lea.vmem %s152_s20, 512  ;;  %p504_p2 = scmp.lt.s32.totalorder %s152_s20, %s152_s20 }
  0x17   : > { %p497_p13 = scmp.ne.s32.totalorder %s152_s20, %s496_s29  ;;  %p505_p5 = scmp.lt.s32.totalorder %s496_s29, %s496_s29 }
  0x19   : > { %p499_p0 = pnand %p497_p13, %p485_p8  ;;  %p506_p4 = por %p505_p5, %p504_p2 }
  0x1b   : > { %p500_p1 = pneg %p499_p0 }
  0x1d   : > { %p507_p3 = pnand %p506_p4, %p500_p1 }
  0x1f   : > { %510 = shalt.err (!%p507_p3)
}
  0x20   : > { %s540_s30 = smov 128   ;;  %s541_s4 = smov 8  }
  0x21   : > { %450 = dma.hbm_to_vmem [thread:$0]  (!%p598_p6), %s645_s1, 512, %s152_s20, [#allocation3], %s540_s30, %s540_s30, %s541_s4  }
  0x22   : > { %p654_p7 = scmp.ne.s32.totalorder %s651_s17, 0 }
  0x23   : > { %p655_p9 = scmp.ne.s32.totalorder (!%p654_p7), %s652_s18, 0 }
  0x24   : > { %180 = sbr.rel (%p654_p7) target bundleno = 270 (0x10e), region = 32 }
  0x2b   : > { %524 = dma.done.wait (%p655_p9), [#allocation3], 512  }
  0x2c   : > { %526 = vsyncadd (%p655_p9), [#allocation3], 4294966784  ;;  %p208_p3 = scmp.lt.s32.totalorder %s529_s12, 1  ;;  %v542_v0 = vmov 0.0|0.0   ;;  %vm543_vm0 = vmmov 0   ;;  %v544_v1 = vmov 0.0  }
  0x2d   : > { %437 = vmatprep.subr.bf16.mxu0 %v542_v0  ;;  %434 = vmatprep.mubr.msk.f32.mxu0 %vm543_vm0, %v544_v1  ;;  %v223_v2 = vld [vmem:[#allocation2] sm:$0xff]  ;;  %v224_v3 = vld [vmem:[#allocation2 + $0x8] sm:$0xff]  ;;  %v225_v4 = vld [vmem:[#allocation2 + $0x10] sm:$0xff]  ;;  %vm234_vm1 = vcmask 261120  }
  0x2e   : > { %s661_s12 = smov (!%p208_p3, %s529_s12), 1  ;;  %v438_v5 = vpack.c.bf16 %v224_v3, %v223_v2  ;;  %v226_v6 = vld [vmem:[#allocation2 + $0x18] sm:$0xff]  ;;  %v417_v9 = vld [vmem:[%s646_s2] ss:$0 sm:$0xff] }
  0x2f   : > { %s415_s7 = sshll.u32 %s661_s12, 3  ;;  %v441_v7 = vpack.c.bf16 %v226_v6, %v225_v4 }
  0x30   : > { %439 = vmatpush3.bf16.msra.mxu0 %v438_v5  ;;  %s211_s10 = scalar_lea.vmem %s644_s0, %s415_s7  ;;  %s221_s19 = scalar_lea.vmem %s647_s3, %s415_s7 }
  0x31   : > { %440 = vmatprep.subr.bf16.mxu0 %v542_v0  ;;  %v222_v8 = vld [vmem:[%s211_s10] sm:$0xff] }
  0x34   : > { %442 = vmatpush3.bf16.msra.mxu0 %v441_v7 }
  0x37   : > { %435 = vmatmul.mubr.msk.f32.vlgmr.msra.gmra.mrb[0].mxu0 %vm234_vm1, %v222_v8 }
 0x10a   : > { %v304_v10 = vpop.f32.mrb[0].mxu0 }
 0x10b   : > { %v305_v11 = vadd.f32 %v417_v9, %v304_v10  ;;  %v436_v12 = vpop.f32.mrb[1].mxu0 }
 0x10d   : > { %308 = vst.msk [vmem:[%s221_s19] sm:$0xff] %vm234_vm1, %v305_v11 }
 0x10e PF: > { %s14_s14 = sadd.s32 1, %s537_s14   ;;  %s656_s12 = smov %s533_s13 }
 0x10f   : > { %p11_p4 = scmp.ge.s32.totalorder %s14_s14, 4   ;;  %s657_s13 = smov %s659_s16 }
 0x111   :  { %13 = sbr.rel (!%p11_p4) target bundleno = 2 (0x2), region = 71 }
 0x118   :  { %334 = vsyncpa [#allocation3], 1 }
 0x119   :  { %336 = vsyncpa [#allocation3 + $0x1], 1 }

// kernel: mha_enc_dec_attention.4
= control target key start
LH: loop header
LB: loop body
LE: loop exit
PB: predicated region body
PF: predicated region fallthrough
CT: control target
= control target key end

     0   :  { %s534_s12 = smov 0   ;;  %s536_s13 = smov 0   ;;  %s582_s0 = inlined_call_operand.vmem [shape: f32[32,32], index: 0, kind: input, shape index: {}]   ;;  %s583_s1 = inlined_call_operand.vmem [shape: f32[32,64], index: 1, kind: input, shape index: {}]   ;;  %s584_s2 = inlined_call_operand.vmem [shape: f32[1,64], index: 2, kind: input, shape index: {}]   ;;  %s585_s3 = inlined_call_operand.vmem [shape: f32[32,64], index: 3, kind: output, shape index: {}]  }
   0x1   :  { %s538_s14 = smov 0  }
   0x2 LB: > { %s25_s15 = sadd.s32 1, %s508_s13  ;;  %p431_p0 = scmp.ge.s32.totalorder %s512_s14, 1  ;;  %s512_s14 = sphi %s538_s14, %s13_s14   ;;  %s508_s13 = sphi %s536_s13, %s587_s13   ;;  %s504_s12 = sphi %s534_s12, %s586_s12  }
   0x3   : > { %p27_p1 = scmp.ge.s32.totalorder %s25_s15, 2  ;;  %p169_p2 = scmp.lt.s32.totalorder %s512_s14, 3 }
   0x5   : > { %s589_s15 = smov (%p27_p1, %s25_s15), 0  ;;  %p170_p3 = pnand %p431_p0, %p169_p2 }
   0x6   : > { %v227_v0 = vld [vmem:[%s583_s1] sm:$0xff] (!%p170_p3)  ;;  %v228_v1 = vld [vmem:[%s583_s1 + $0x8] sm:$0xff] (!%p170_p3)  ;;  %v229_v2 = vld [vmem:[%s583_s1 + $0x10] sm:$0xff] (!%p170_p3)  ;;  %s432_s22 = sshll.u32 (!%p170_p3), %s504_s12, 1  ;;  %vm238_vm0 = vcmask (!%p170_p3), 261120   ;;  %vm320_vm1 = vcmask (!%p170_p3), 523264  }
   0x7   : > { %173 = sbr.rel (%p170_p3) target bundleno = 235 (0xeb), region = 32  ;;  %v458_v3 = vpack.c.bf16 (!%p170_p3), %v228_v1, %v227_v0  ;;  %v230_v4 = vld [vmem:[%s583_s1 + $0x18] sm:$0xff] (!%p170_p3)  ;;  %p204_p4 = scmp.lt.s32.totalorder (!%p170_p3), %s432_s22, 3  ;;  %v436_v8 = vld [vmem:[%s584_s2] ss:$0 sm:$0xff] (!%p170_p3) }
   0x8   : > { %v462_v5 = vpack.c.bf16 (!%p170_p3), %v230_v4, %v229_v2 }
   0x9   : > { %459 = vmatprep.subr.bf16.mxu0 (!%p170_p3), %v458_v3 }
   0xa   : > { %461 = vmatpush3.bf16.msra.mxu0 (!%p170_p3), %v458_v3 }
   0xb   : > { %463 = vmatprep.subr.bf16.mxu0 (!%p170_p3), %v462_v5 }
   0xe   : > { %s591_s22 = smov (!%p204_p4, %s432_s22), 3  ;;  %465 = vmatpush3.bf16.msra.mxu0 %v462_v5 }
   0xf   : > { %s433_s25 = sshll.u32 %s591_s22, 3 }
  0x10   : > { %s207_s28 = scalar_lea.vmem %s582_s0, %s433_s25  ;;  %s223_s6 = scalar_lea.vmem %s585_s3, %s433_s25 }
  0x11   : > { %v225_v6 = vld [vmem:[%s207_s28] sm:$0xff]  ;;  %v226_v7 = vld [vmem:[%s207_s28 + $0x8] sm:$0xff] }
  0x12   : > { %455 = vmatprep.mubr.msk.f32.mxu0 %vm238_vm0, %v225_v6 }
  0x13   : > { %456 = vmatmul.mubr.msk.f32.vlgmr.msra.gmra.mrb[0].mxu0 %vm238_vm0, %v226_v7 }
  0xe6   : > { %v457_v9 = vpop.f32.mrb[0].mxu0 }
  0xe7   : > { %v311_v10 = vpop.f32.mrb[1].mxu0  ;;  %v317_v12 = vadd.f32 %v457_v9, %v436_v8 }
  0xe8   : > { %v312_v11 = vadd.f32 %v436_v8, %v311_v10 }
  0xe9   : > { %322 = vst.msk [vmem:[%s223_s6 + $0x8] sm:$0xff] %vm320_vm1, %v317_v12 }
  0xea   : > { %321 = vst.msk [vmem:[%s223_s6] sm:$0xff] %vm320_vm1, %v312_v11 }
  0xeb PF: > { %s13_s14 = sadd.s32 1, %s512_s14   ;;  %s586_s12 = smov %s508_s13 }
  0xec   : > { %p10_p5 = scmp.ge.s32.totalorder %s13_s14, 4   ;;  %s587_s13 = smov %s589_s15 }
  0xee   :  { %12 = sbr.rel (!%p10_p5) target bundleno = 2 (0x2), region = 68 }

// kernel: mha_enc_dec_attention.5
= control target key start
LH: loop header
LB: loop body
LE: loop exit
PB: predicated region body
PF: predicated region fallthrough
CT: control target
= control target key end

     0   :  { %9 = vsyncpa [#allocation3], 0  ;;  %s1755_s0 = inlined_call_operand.vmem [shape: f32[2,8,32], index: 0, kind: input, shape index: {}]   ;;  %s1756_s1 = inlined_call_operand.vmem [shape: f32[2,16,64], index: 1, kind: input, shape index: {}]   ;;  %s1757_s2 = inlined_call_operand.vmem [shape: f32[32,32], index: 2, kind: input, shape index: {}]   ;;  %s1758_s3 = inlined_call_operand.vmem [shape: f32[1,32], index: 3, kind: input, shape index: {}]   ;;  %s1759_s4 = inlined_call_operand.hbm [shape: f32[2,8,32], index: 4, kind: output, shape index: {}]  }
   0x1   :  { %11 = vsyncpa [#allocation3 + $0x1], 0  ;;  %s1541_s15 = smov 0   ;;  %s1543_s16 = smov 0  }
   0x2   :  { %s1545_s17 = smov 0   ;;  %s1547_s18 = smov 0  }
   0x3   :  { %s1549_s19 = smov 0   ;;  %s1551_s20 = smov 0  }
   0x4 LB: > { %s1141_s21 = sadd.s32 4294967295, %s1500_s20   ;;  %s1142_s22 = sadd.s32 4294967294, %s1500_s20   ;;  %s1500_s20 = sphi %s1551_s20, %s17_s20   ;;  %s1496_s19 = sphi %s1549_s19, %s1768_s19   ;;  %s1492_s18 = sphi %s1547_s18, %s1767_s18   ;;  %s1488_s17 = sphi %s1545_s17, %s1766_s17   ;;  %s1484_s16 = sphi %s1543_s16, %s1765_s16   ;;  %s1480_s15 = sphi %s1541_s15, %s1764_s15  }
   0x5   : > { %s29_s23 = sadd.s32 1, %s1496_s19  ;;  %s134_s24 = sadd.s32 1, %s1488_s17 }
   0x6   : > { %p31_p0 = scmp.ge.s32.totalorder %s29_s23, 2  ;;  %p144_p1 = scmp.ne.s32.totalorder %s1488_s17, %s1484_s16 }
   0x7   : > { %p145_p2 = scmp.eq.s32.totalorder %s1141_s21, 1  ;;  %p150_p3 = scmp.ne.s32.totalorder %s1484_s16, %s1480_s15 }
   0x8   : > { %s1770_s23 = smov (%p31_p0, %s29_s23), 0  ;;  %p151_p5 = scmp.eq.s32.totalorder %s1142_s22, 1 }
   0x9   : > { %p1581_p4 = por %p145_p2, %p144_p1  ;;  %s129_s26 = ssub.s32 %s1496_s19, %s1770_s23 }
   0xa   : > { %p1145_p6 = scmp.ge.s32.totalorder %s1500_s20, 1  ;;  %p132_p7 = scmp.eq.s32.totalorder %s129_s26, 0 }
   0xb   : > { %p1588_p8 = por %p151_p5, %p150_p3  ;;  %p193_p9 = scmp.lt.s32.totalorder %s1500_s20, 3 }
   0xc   : > { %s1594_s28 = scalar_select %p132_p7, %s1488_s17, %s134_s24  }
   0xd   : > { %p194_p10 = pnand %p1145_p6, %p193_p9 }
   0xe   : > { %p226_p11 = scmp.lt.s32.totalorder (!%p194_p10), %s1492_s18, 1  ;;  %v1502_v0 = vmov (!%p194_p10), 0.0|0.0   ;;  %vm1503_vm0 = vmmov (!%p194_p10), 0   ;;  %v1504_v1 = vmov (!%p194_p10), 0.0   ;;  %vm242_vm1 = vcmask (!%p194_p10), 64512   ;;  %s1505_s12 = smov (!%p194_p10), 120  }
   0xf   : > { %197 = sbr.rel (%p194_p10) target bundleno = 1730 (0x6c2), region = 36  ;;  %1269 = vmatprep.subr.bf16.mxu0 (!%p194_p10), %v1502_v0  ;;  %1206 = vmatprep.mubr.msk.f32.mxu0 (!%p194_p10), %vm1503_vm0, %v1504_v1  ;;  %vm1612_vm2 = vmpackc.low (!%p194_p10), %vm242_vm1, %vm242_vm1  ;;  %s1506_s13 = smov (!%p194_p10), 112   ;;  %vm322_vm3 = vcmask (!%p194_p10), 130048   ;;  %vm955_vm4 = vcmask (!%p194_p10), 195584   ;;  %vm968_vm5 = vcmask (!%p194_p10), 261120  }
  0x10   : > { %1273 = vmatprep.subr.bf16.mxu1 (!%p194_p10), %v1502_v0  ;;  %1213 = vmatprep.mubr.msk.f32.mxu1 (!%p194_p10), %vm1503_vm0, %v1504_v1  ;;  %s1507_s14 = smov (!%p194_p10), 96   ;;  %s1508_s21 = smov (!%p194_p10), 88  }
  0x11   : > { %s1509_s22 = smov (!%p194_p10), 80   ;;  %s1510_s24 = smov (!%p194_p10), 72  }
  0x12   : > { %s1511_s26 = smov (!%p194_p10), 104  }
  0x16   : > { %s227_s29 = scalar_select %p226_p11, %s1492_s18, 1 }
  0x18   : > { %s1172_s30 = sshll.u32 %s227_s29, 4  ;;  %s1147_s5 = sshll.u32 %s227_s29, 3 }
  0x19   : > { %s237_s8 = scalar_lea.vmem %s1756_s1, %s1172_s30  ;;  %s232_s11 = scalar_lea.vmem %s1755_s0, %s1147_s5 }
  0x1a   : > { %v240_v2 = vld [vmem:[%s237_s8] sm:$0xff]  ;;  %v241_v3 = vld [vmem:[%s237_s8 + $0x8] sm:$0xff]  ;;  %s1512_s29 = smov 16   ;;  %s1513_s30 = smov 8  }
  0x1b   : > { %v1270_v5 = vpack.c.bf16 %v241_v3, %v240_v2  ;;  %v1616_v6 = vpack.i.bf16 %v241_v3, %v240_v2  ;;  %v238_v7 = vld [vmem:[%s232_s11] sm:$0xff] }
  0x1c   : > { %v1622_v8 = vmul.f32 0.35355338, %v238_v7 }
  0x1d   : > { %1272 = vmatpush3.bf16.xpose.msk.msra.mxu0 %vm1612_vm2, %v1270_v5  ;;  %1377 = vrot.lane.b32.xlu1 %v1616_v6, %s1505_s12 }
  0x1e   : > { %1283 = vmatprep.subr.bf16.mxu0 %v1502_v0 }
  0x21   : > { %416 = vrot.lane.b32.xlu1 %v1622_v8, %s1505_s12 }
  0x24   : > { %1207 = vmatmul.mubr.msk.f32.vlgmr.msra.gmra.mrb[0].mxu0 %vm242_vm1, %v1622_v8 }
  0x25   : > { %1382 = vrot.lane.b32.xlu1 %v1616_v6, %s1506_s13  ;;  %1234 = vmatprep.mubr.msk.f32.mxu0 %vm1503_vm0, %v1504_v1 }
  0x29   : > { %591 = vrot.lane.b32.xlu1 %v1622_v8, %s1506_s13  ;;  %s1514_s13 = smov 24  }
  0x2d   : > { %1387 = vrot.lane.b32.xlu1 %v1616_v6, %s1508_s21 }
  0x8f   : > { %v1378_v9 = vpop.permute.xlu1 %1377 }
  0x90   : > { %v1380_v29 = vunpack.i.h.bf16 %v1378_v9  ;;  %v1379_v30 = vunpack.i.l.bf16 %v1378_v9 }
  0x92   : > { %v1277_v31 = vpack.c.bf16 %v1380_v29, %v1379_v30  ;;  %v959_v29 = vld [vmem:[%s1757_s2 + $0x10] sm:$0xff] }
  0x93   : > { %v417_v10 = vpop.permute.xlu1 %416 }
  0x97   : > { %v1383_v11 = vpop.permute.xlu1 %1382 }
  0x98   : > { %v1385_v12 = vunpack.i.h.bf16 %v1383_v11  ;;  %v1384_v13 = vunpack.i.l.bf16 %v1383_v11 }
  0x9a   : > { %v1284_v14 = vpack.c.bf16 %v1385_v12, %v1384_v13 }
  0x9b   : > { %v592_v15 = vpop.permute.xlu1 %591 }
  0x9c   : > { %1286 = vmatpush3.bf16.xpose.msk.msra.mxu0 %vm1612_vm2, %v1284_v14 }
  0x9d   : > { %1294 = vmatprep.subr.bf16.mxu0 %v1502_v0 }
  0x9f   : > { %v1388_v33 = vpop.permute.xlu1 %1387 }
  0xa0   : > { %v1390_v34 = vunpack.i.h.bf16 %v1388_v33  ;;  %v1389_v35 = vunpack.i.l.bf16 %v1388_v33 }
  0xa2   : > { %v1281_v36 = vpack.c.bf16 %v1390_v34, %v1389_v35 }
  0xa3   : > { %1235 = vmatmul.mubr.msk.f32.vlgmr.msra.gmra.mrb[2].mxu0 %vm242_vm1, %v592_v15 }
  0xa4   : > { %1255 = vmatprep.mubr.msk.f32.mxu0 %vm1503_vm0, %v1504_v1 }
  0xf7   : > { %v318_v16 = vpop.f32.mrb[0].mxu0 }
  0xf8   : > { %v1208_v17 = vpop.f32.mrb[1].mxu0  ;;  %v323_v18 = vsel %vm322_vm3, %v318_v16, -inf }
  0xf9   : > { %324 = vmax.xlane.f32.xlu0 %v323_v18 }
 0x10f   : > { %1372 = vrot.lane.b32.xlu0 %v1616_v6, %s1507_s14  ;;  %s223_s14 = sand.u32 1, %s1484_s16  }
 0x110   : > { %s1146_s21 = sshll.u32 %s223_s14, 3  ;;  %s1044_s8 = scalar_lea.sflag [#allocation3], %s223_s14 }
 0x176   : > { %v669_v19 = vpop.f32.mrb[2].mxu0 }
 0x177   : > { %v673_v20 = vsel %vm322_vm3, %v669_v19, -inf  ;;  %v1236_v21 = vpop.f32.mrb[3].mxu0 }
 0x178   : > { %674 = vmax.xlane.f32.xlu0 %v673_v20 }
 0x186   : > { %v325_v22 = vpop.xlane.xlu0 %324 }
 0x187   : > { %v326_v23 = vsub.f32 %v318_v16, %v325_v22 }
 0x189   : > { %v327_v24 = vmul.f32 1.442695, %v326_v23 }
 0x18a   : > { %v1373_v25 = vpop.permute.xlu0 %1372 }
 0x18b   : > { %1406 = vpow2.f32 %v327_v24  ;;  %v1375_v26 = vunpack.i.h.bf16 %v1373_v25  ;;  %v1374_v27 = vunpack.i.l.bf16 %v1373_v25 }
 0x18d   : > { %v1274_v28 = vpack.c.bf16 %v1375_v26, %v1374_v27 }
 0x18e   : > { %1392 = vrot.lane.b32.xlu0 %v1616_v6, %s1509_s22 }
 0x18f   : > { %1275 = vmatpush3.bf16.msra.mxu1 %v1274_v28  ;;  %v957_v28 = vld [vmem:[%s1757_s2] sm:$0xff] }
 0x190   : > { %1276 = vmatprep.subr.bf16.mxu1 %v1502_v0 }
 0x192   : > { %1402 = vrot.lane.b32.xlu0 %v1616_v6, %s1510_s24 }
 0x195   : > { %v1642_v32 = vpop.eup %1406 }
 0x196   : > { %1214 = vmatmul.mubr.msk.f32.vlgmr.msra.gmra.mrb[0].mxu1 %vm322_vm3, %v1642_v32  ;;  %v329_v11 = vsel %vm322_vm3, %v1642_v32, 0.0 }
 0x197   : > { %1220 = vmatprep.mubr.msk.f32.mxu1 %vm1503_vm0, %v1504_v1 }
 0x198   : > { %1279 = vmatpush3.bf16.xpose.msk.msra.mxu1 %vm1612_vm2, %v1277_v31  ;;  %v960_v31 = vld [vmem:[%s1757_s2 + $0x18] sm:$0xff] }
 0x199   : > { %1280 = vmatprep.subr.bf16.mxu1 %v1502_v0  ;;  %v1301_v32 = vpack.c.bf16 %v960_v31, %v959_v29 }
 0x19f   : > { %1221 = vmatmul.mubr.msk.f32.vlgmr.msra.gmra.mrb[2].mxu1 %vm242_vm1, %v417_v10 }
 0x1a0   : > { %1227 = vmatprep.mubr.msk.f32.mxu1 %vm1503_vm0, %v1504_v1  ;;  %1282 = vmatpush3.bf16.msra.mxu1 %v1281_v36 }
 0x1a1   : > { %1287 = vmatprep.subr.bf16.mxu1 %v1502_v0 }
 0x205   : > { %v675_v42 = vpop.xlane.xlu0 %674 }
 0x206   : > { %v676_v49 = vsub.f32 %v669_v19, %v675_v42 }
 0x208   : > { %v677_v52 = vmul.f32 1.442695, %v676_v49 }
 0x209   : > { %v1393_v43 = vpop.permute.xlu0 %1392 }
 0x20a   : > { %v1395_v53 = vunpack.i.h.bf16 %v1393_v43  ;;  %v1394_v54 = vunpack.i.l.bf16 %v1393_v43 }
 0x20c   : > { %v1288_v55 = vpack.c.bf16 %v1395_v53, %v1394_v54  ;;  %v1166_v53 = vld [vmem:[%s1758_s3] ss:$0 sm:$0xff] }
 0x20d   : > { %v1403_v44 = vpop.permute.xlu0 %1402 }
 0x20e   : > { %v1405_v45 = vunpack.i.h.bf16 %v1403_v44  ;;  %v1404_v46 = vunpack.i.l.bf16 %v1403_v44 }
 0x210   : > { %v1295_v47 = vpack.c.bf16 %v1405_v45, %v1404_v46 }
 0x212   : > { %1296 = vmatpush3.bf16.msra.mxu0 %v1295_v47 }
 0x213   : > { %1297 = vmatprep.subr.bf16.mxu0 %v1502_v0 }
 0x269   : > { %v1657_v37 = vpop.f32.mrb[0].mxu1 }
 0x26a   : > { %v1215_v38 = vpop.f32.mrb[1].mxu1 }
 0x272   : > { %v494_v39 = vpop.f32.mrb[2].mxu1 }
 0x273   : > { %v1222_v40 = vpop.f32.mrb[3].mxu1  ;;  %v498_v41 = vsel %vm322_vm3, %v494_v39, -inf }
 0x274   : > { %499 = vmax.xlane.f32.xlu1 %v498_v41 }
 0x285   : > { %1397 = vrot.lane.b32.xlu1 %v1616_v6, %s1511_s26 }
 0x289   : > { %766 = vrot.lane.b32.xlu1 %v1622_v8, %s1511_s26  ;;  %s1169_s26 = sshll.u32 %s1492_s18, 7  ;;  %s1515_s18 = smov [#allocation2]  }
 0x28a   : > { %s1707_s7 = scalar_lea.hbm %s1759_s4, %s1169_s26  ;;  %s1426_s10 = sshll.u32 %s1515_s18, 4  ;;  %s1427_s10 = int_to_ptr.vmem [resolvable:$false] %s1426_s10 }
 0x28b   : > { %s1428_s11 = scalar_lea.vmem %s1427_s10, 256 }
 0x301   : > { %v500_v48 = vpop.xlane.xlu1 %499 }
 0x302   : > { %v501_v50 = vsub.f32 %v494_v39, %v500_v48 }
 0x304   : > { %v502_v51 = vmul.f32 1.442695, %v501_v50 }
 0x305   : > { %v1398_v57 = vpop.permute.xlu1 %1397 }
 0x306   : > { %1408 = vpow2.f32 %v502_v51  ;;  %v1400_v59 = vunpack.i.h.bf16 %v1398_v57  ;;  %v1399_v60 = vunpack.i.l.bf16 %v1398_v57 }
 0x307   : > { %1410 = vpow2.f32 %v677_v52 }
 0x308   : > { %v1291_v62 = vpack.c.bf16 %v1400_v59, %v1399_v60 }
 0x309   : > { %v767_v63 = vpop.permute.xlu1 %766 }
 0x310   : > { %v1409_v56 = vpop.eup %1408 }
 0x311   : > { %1228 = vmatmul.mubr.msk.f32.vlgmr.msra.gmra.mrb[4].mxu1 %vm322_vm3, %v1409_v56  ;;  %v504_v58 = vsel %vm322_vm3, %v1409_v56, 0.0  ;;  %v1411_v61 = vpop.eup %1410 }
 0x312   : > { %1289 = vmatpush3.bf16.msra.mxu1 %v1288_v55  ;;  %505 = vadd.xlane.f32.xlu0 %v504_v58  ;;  %v679_v10 = vsel %vm322_vm3, %v1411_v61, 0.0 }
 0x313   : > { %1241 = vmatprep.mubr.msk.f32.mxu1 %vm1503_vm0, %v1504_v1  ;;  %1290 = vmatprep.subr.bf16.mxu1 %v1502_v0 }
 0x315   : > { %1242 = vmatmul.mubr.msk.f32.vlgmr.msra.gmra.mrb[6].mxu1 %vm322_vm3, %v1411_v61 }
 0x316   : > { %1248 = vmatprep.mubr.msk.f32.mxu1 %vm1503_vm0, %v1504_v1 }
 0x31b   : > { %1293 = vmatpush3.bf16.xpose.msk.msra.mxu1 %vm1612_vm2, %v1291_v62 }
 0x322   : > { %1249 = vmatmul.mubr.msk.f32.vlgmr.msra.gmra.mrb[8].mxu1 %vm242_vm1, %v767_v63 }
 0x39f   : > { %v506_v15 = vpop.xlane.xlu0 %505 }
 0x3e4   : > { %v582_v2 = vpop.f32.mrb[4].mxu1 }
 0x3e5   : > { %v1229_v3 = vpop.f32.mrb[5].mxu1 }
 0x3e8   : > { %v757_v5 = vpop.f32.mrb[6].mxu1 }
 0x3e9   : > { %v1243_v6 = vpop.f32.mrb[7].mxu1 }
 0x3f5   : > { %v844_v7 = vpop.f32.mrb[8].mxu1 }
 0x3f6   : > { %v1250_v8 = vpop.f32.mrb[9].mxu1  ;;  %v848_v9 = vsel %vm322_vm3, %v844_v7, -inf }
 0x3f7   : > { %849 = vmax.xlane.f32.xlu1 %v848_v9 }
 0x3fb   : > { %680 = vadd.xlane.f32.xlu1 %v679_v10 }
 0x3ff   : > { %330 = vadd.xlane.f32.xlu1 %v329_v11 }
 0x484   : > { %v850_v4 = vpop.xlane.xlu1 %849 }
 0x485   : > { %v851_v12 = vsub.f32 %v844_v7, %v850_v4 }
 0x487   : > { %v852_v13 = vmul.f32 1.442695, %v851_v12 }
 0x488   : > { %v681_v14 = vpop.xlane.xlu1 %680 }
 0x489   : > { %1412 = vpow2.f32 %v852_v13 }
 0x48a   : > { %1414 = vrcp.f32 %v681_v14 }
 0x48b   : > { %1416 = vrcp.f32 %v506_v15 }
 0x48c   : > { %v331_v42 = vpop.xlane.xlu1 %330 }
 0x493   : > { %v1413_v16 = vpop.eup %1412 }
 0x494   : > { %v1415_v17 = vpop.eup %1414  ;;  %1256 = vmatmul.mubr.msk.f32.vlgmr.msra.gmra.mrb[4].mxu0 %vm322_vm3, %v1413_v16  ;;  %v854_v18 = vsel %vm322_vm3, %v1413_v16, 0.0 }
 0x495   : > { %v762_v19 = vmul.f32 %v1415_v17, %v681_v14  ;;  %855 = vadd.xlane.f32.xlu0 %v854_v18  ;;  %1266 = vmatprep.mubr.msk.f32.mxu0 %vm1503_vm0, %v1504_v1  ;;  %v1417_v23 = vpop.eup %1416  ;;  %v958_v1 = vld [vmem:[%s1757_s2 + $0x8] sm:$0xff] }
 0x496   : > { %v587_v24 = vmul.f32 %v1417_v23, %v506_v15  ;;  %v1298_v30 = vpack.c.bf16 %v958_v1, %v957_v28 }
 0x497   : > { %v763_v20 = vsub.f32 2.0, %v762_v19 }
 0x498   : > { %v588_v25 = vsub.f32 2.0, %v587_v24  ;;  %1299 = vmatpush3.bf16.msra.mxu0 %v1298_v30 }
 0x499   : > { %v764_v21 = vmul.f32 %v1415_v17, %v763_v20  ;;  %1300 = vmatprep.subr.bf16.mxu0 %v1502_v0 }
 0x49a   : > { %v589_v26 = vmul.f32 %v1417_v23, %v588_v25 }
 0x49b   : > { %v765_v22 = vmul.f32 %v764_v21, %v757_v5 }
 0x49c   : > { %v590_v27 = vmul.f32 %v589_v26, %v582_v2  ;;  %1302 = vmatpush3.bf16.msra.mxu0 %v1301_v32 }
 0x49d   : > { %946 = vrot.lane.b32.xlu1 %v765_v22, %s1512_s29  ;;  %s225_s29 = scalar_lea.vmem [#allocation2], %s1146_s21 }
 0x4ab   : > { %942 = vrot.lane.b32.xlu0 %v590_v27, %s1513_s30  ;;  %s1058_s30 = sshll.u32 %s225_s29, 4  ;;  %s1709_s30 = int_to_ptr.vmem [resolvable:$true] %s1058_s30 }
 0x4ac   : > { %s1422_s9 = scalar_lea.vmem %s1709_s30, 128  ;;  %p1429_p1 = scmp.lt.s32.totalorder %s1709_s30, %s1427_s10 }
 0x4ad   : > { %p1423_p12 = scmp.ne.s32.totalorder %s1709_s30, %s1422_s9  ;;  %p1430_p2 = scmp.lt.s32.totalorder %s1428_s11, %s1422_s9 }
 0x4af   : > { %p1424_p13 = pnand %p1423_p12, %p1581_p4  ;;  %p1431_p3 = por %p1430_p2, %p1429_p1 }
 0x4b1   : > { %p1425_p0 = pneg %p1424_p13 }
 0x4b3   : > { %p1432_p5 = pnand %p1431_p3, %p1425_p0 }
 0x50f   : > { %v947_v48 = vpop.permute.xlu1 %946 }
 0x522   : > { %v856_v33 = vpop.xlane.xlu0 %855 }
 0x523   : > { %1418 = vrcp.f32 %v856_v33 }
 0x524   : > { %1420 = vrcp.f32 %v331_v42 }
 0x526   : > { %v943_v46 = vpop.permute.xlu0 %942 }
 0x52d   : > { %v1419_v34 = vpop.eup %1418 }
 0x52e   : > { %v937_v35 = vmul.f32 %v1419_v34, %v856_v33  ;;  %v1421_v43 = vpop.eup %1420 }
 0x52f   : > { %v412_v44 = vmul.f32 %v1421_v43, %v331_v42 }
 0x530   : > { %v938_v36 = vsub.f32 2.0, %v937_v35 }
 0x531   : > { %v413_v45 = vsub.f32 2.0, %v412_v44 }
 0x532   : > { %v939_v38 = vmul.f32 %v1419_v34, %v938_v36 }
 0x533   : > { %v414_v0 = vmul.f32 %v1421_v43, %v413_v45 }
 0x535   : > { %v415_v47 = vmul.f32 %v414_v0, %v1657_v37 }
 0x537   : > { %v953_v49 = vsel %vm242_vm1, %v415_v47, %v943_v46 }
 0x538   : > { %v954_v50 = vsel %vm322_vm3, %v953_v49, %v947_v48 }
 0x567   : > { %v932_v39 = vpop.f32.mrb[4].mxu0 }
 0x568   : > { %v940_v40 = vmul.f32 %v939_v38, %v932_v39  ;;  %v1257_v41 = vpop.f32.mrb[5].mxu0 }
 0x56a   : > { %950 = vrot.lane.b32.xlu1 %v940_v40, %s1514_s13 }
 0x5dc   : > { %v951_v51 = vpop.permute.xlu1 %950 }
 0x5dd   : > { %v956_v52 = vsel %vm955_vm4, %v954_v50, %v951_v51 }
 0x5de   : > { %1267 = vmatmul.mubr.msk.f32.vlgmr.msra.gmra.mrb[6].mxu0 %vm968_vm5, %v956_v52 }
 0x6b1   : > { %v1038_v37 = vpop.f32.mrb[6].mxu0 }
 0x6b2   : > { %v1039_v54 = vadd.f32 %v1166_v53, %v1038_v37  ;;  %v1268_v55 = vpop.f32.mrb[7].mxu0 }
 0x6b4   : > { %1042 = vst.msk [vmem:[%s225_s29] sm:$0xff] %vm968_vm5, %v1039_v54 }
 0x6b5   : > { %1435 = shalt.err (!%p1432_p5)
}
 0x6b6   : > { %s1436_s12 = scalar_lea.hbm %s1707_s7, 128  ;;  %s1440_s21 = scalar_lea.hbm %s1759_s4, 256 }
 0x6b7   : > { %p1437_p6 = scmp.ne.s32.totalorder %s1707_s7, %s1436_s12  ;;  %p1441_p10 = scmp.lt.u32.totalorder %s1707_s7, %s1759_s4 }
 0x6b8   : > { %p1442_p11 = scmp.lt.u32.totalorder %s1440_s21, %s1436_s12  ;;  %p1444_p13 = scmp.lt.u32.totalorder %s1436_s12, %s1707_s7 }
 0x6b9   : > { %p1438_p7 = pnand %p1437_p6, %p1581_p4 }
 0x6ba   : > { %p1443_p12 = por %p1442_p11, %p1441_p10 }
 0x6bb   : > { %p1439_p9 = pneg %p1438_p7 }
 0x6bc   : > { %p1445_p0 = por %p1444_p13, %p1443_p12 }
 0x6be   : > { %p1446_p1 = pnand %p1445_p0, %p1439_p9 }
 0x6c0   : > { %1449 = shalt.err (!%p1446_p1)
}
 0x6c1   : > { %1303 = dma.vmem_to_hbm [thread:$0]  (%p1581_p4), %s1709_s30, 128, %s1707_s7, %s1044_s8  }
 0x6c2 PF: > { %p1309_p2 = scmp.ge.s32.totalorder %s1500_s20, 2  ;;  %s1070_s26 = sand.u32 1, %s1480_s15  }
 0x6c3   : > { %s1071_s29 = scalar_lea.sflag [#allocation3], %s1070_s26 }
 0x6c4   : > { %p1306_p3 = pnand %p1309_p2, %p1588_p8 }
 0x6c6   : > { %1475 = dma.done.wait (!%p1306_p3), %s1071_s29, 128  }
 0x6c7   : > { %1477 = vsyncadd (!%p1306_p3), %s1071_s29, 4294967168  ;;  %s17_s20 = sadd.s32 1, %s1500_s20   ;;  %s1764_s15 = smov %s1484_s16 }
 0x6c8   : > { %p14_p5 = scmp.ge.s32.totalorder %s17_s20, 4   ;;  %s1765_s16 = smov %s1488_s17 }
 0x6c9   : > { %s1766_s17 = smov %s1594_s28  ;;  %s1767_s18 = smov %s1496_s19 }
 0x6ca   : > { %s1768_s19 = smov %s1770_s23  ;;  %16 = sbr.rel (!%p14_p5) target bundleno = 4 (0x4), region = 74 }
 0x6d1   :  { %1076 = vsyncpa [#allocation3], 1 }
 0x6d2   :  { %1078 = vsyncpa [#allocation3 + $0x1], 1 }

</bundles_post_ra>
